<compile_context>
chip_gen: v7x
topology: tpu7x:2x2x1
jax: 0.10.0
libtpu: 0.0.40
codegen_flags: <defaults>
</compile_context>

<pallas_src>
import functools

import jax
import jax.numpy as jnp
from jax import lax
from jax.experimental import pallas as pl
from jax.experimental.pallas import tpu as pltpu


def _cdiv(a, b):
    return (a + b - 1) // b


def _round_up(n, m):
    return _cdiv(n, m) * m


def _encoder_kernel(x_ref, w1_ref, part_ref, *, n_nodes, tile):
    """Grid = (n_split cores, node tiles per core).

    Accumulates this core's partial of acc_T = W1.T @ x (shape [E, F], f32)
    directly into its resident output block part_ref[c] (P3 pattern)."""
    k = pl.program_id(1)

    @pl.when(k == 0)
    def _():
        part_ref[...] = jnp.zeros_like(part_ref)

    # Un-clamped global node-tile index -> number of valid rows in this tile.
    g = pl.program_id(0) * pl.num_programs(1) + k
    rem = n_nodes - g * tile
    row = lax.broadcasted_iota(jnp.int32, (tile, 1), 0)
    valid = row < rem  # all-False for fully out-of-range (clamped) tiles

    # Mask BOTH operands (0 * garbage could be NaN), then cast to bf16 in VMEM.
    x_t = jnp.where(valid, x_ref[...], 0.0).astype(jnp.bfloat16)   # [tile, F]
    w_t = jnp.where(valid, w1_ref[...], 0.0).astype(jnp.bfloat16)  # [tile, E]

    # dim0/dim0 contraction (A^T B): MXU-native, no per-step transpose.
    part_ref[0] += lax.dot_general(
        w_t, x_t, (((0,), (0,)), ((), ())),
        preferred_element_type=jnp.float32)                        # [E, F] f32


def _decoder_kernel(part_ref, b1_ref, w2_ref, b2_ref, emb_ref, out_ref, h2t_ref):
    """Grid = (n_split cores, node tiles per core).

    k == 0: tiny epilogue (sum partials, bias, relu, dense2, bias) recomputed
    once per core into a resident VMEM scratch h2t (= h2.T, [O, F]).
    Every step: x_hat row tile = struct_embed tile @ h2.T."""
    k = pl.program_id(1)

    @pl.when(k == 0)
    def _():
        # TODO(synk): F.dropout treated as identity (p = 0 / eval mode); a
        # stochastic version would use pltpu.prng_seed / pltpu.prng_random_bits.
        acc_t = jnp.sum(part_ref[...], axis=0)                      # [E, F] f32
        h1_t = jnp.maximum(acc_t + b1_ref[...], 0.0)                # relu(dense1)
        h2_t = lax.dot_general(                                     # [O, F] f32
            w2_ref[...], h1_t, (((0,), (0,)), ((), ())),
            preferred_element_type=jnp.float32) + b2_ref[...]
        h2t_ref[...] = h2_t.astype(h2t_ref.dtype)

    out = jnp.dot(emb_ref[...].astype(jnp.bfloat16), h2t_ref[...],
                  preferred_element_type=jnp.float32)               # [tile, F]
    out_ref[...] = out.astype(out_ref.dtype)


def attribute_ae_forward(x, struct_embed, w1, b1, w2, b2, *,
                         node_tile=512, out_dtype=jnp.float32):
    """x: [N, F] node attributes; struct_embed: [N, O]; w1: [N, E] (dense1
    weight pre-transposed to [in, out], in_dim == #nodes N); b1: [E];
    w2: [E, O]; b2: [O].  Returns x_hat: [N, F] (dtype `out_dtype`)."""
    N, F = x.shape
    N2, O = struct_embed.shape
    Nw, E = w1.shape
    assert N2 == N and Nw == N and w2.shape == (E, O)
    assert b1.shape == (E,) and b2.shape == (O,)

    # ---- node-tile selection (multiple of 128, as large as VMEM allows) -----
    if N < 128:
        tile = N                                   # single full-extent block
    else:
        tile = min(_round_up(node_tile, 128), (N // 128) * 128)
        budget = 24 << 20                          # headroom under 32 MiB limit
        resident = 4 * 2 * E * F + 4 * E * O       # decoder-resident partials+W2
        while tile > 128 and max(8 * tile * (F + E),
                                 8 * tile * (O + F) + resident) > budget:
            tile -= 128
    grid_n = _cdiv(N, tile)
    n_split = 2 if grid_n >= 2 else 1              # v7x: use both TensorCores
    n_inner = _cdiv(grid_n, n_split)

    def node_map(c, k):
        # Clamp fully-out-of-range tiles (odd grid_n) onto the last real tile;
        # the in-kernel row mask zeroes them (encoder) / the duplicate store
        # rewrites identical data (decoder).
        return (jnp.minimum(c * n_inner + k, grid_n - 1), 0)

    f32 = jnp.float32
    b1c = b1.astype(f32).reshape(E, 1)     # tiny column biases (not N-scaled)
    b2c = b2.astype(f32).reshape(O, 1)
    w2f = w2.astype(f32)

    # ---- pass 1: per-core partial accumulators of acc_T = W1.T @ x ----------
    enc_cost = pl.CostEstimate(
        flops=2 * N * F * E, transcendentals=0,
        bytes_accessed=int(4 * N * (F + E) + 4 * n_split * E * F))

    partials = pl.pallas_call(
        functools.partial(_encoder_kernel, n_nodes=N, tile=tile),
        out_shape=jax.ShapeDtypeStruct((n_split, E, F), f32),
        grid_spec=pltpu.PrefetchScalarGridSpec(
            num_scalar_prefetch=0,
            grid=(n_split, n_inner),
            in_specs=[
                pl.BlockSpec((tile, F), node_map),   # x node-tile (streamed)
                pl.BlockSpec((tile, E), node_map),   # W1 node-tile (streamed)
            ],
            out_specs=pl.BlockSpec((1, E, F), lambda c, k: (c, 0, 0))),
        compiler_params=pltpu.CompilerParams(
            dimension_semantics=("parallel", "arbitrary"),
            vmem_limit_bytes=32 << 20),
        cost_estimate=enc_cost,
    )(x, w1)

    # ---- pass 2: epilogue (per core) + x_hat = struct_embed @ h2.T ----------
    out_bytes = jnp.dtype(out_dtype).itemsize
    dec_cost = pl.CostEstimate(
        flops=2 * N * O * F + n_split * 2 * E * O * F, transcendentals=0,
        bytes_accessed=int(4 * N * O + out_bytes * N * F
                           + 4 * (n_split * E * F + E * O + E + O)))

    x_hat = pl.pallas_call(
        _decoder_kernel,
        out_shape=jax.ShapeDtypeStruct((N, F), out_dtype),
        grid_spec=pltpu.PrefetchScalarGridSpec(
            num_scalar_prefetch=0,
            grid=(n_split, n_inner),
            in_specs=[
                pl.BlockSpec((n_split, E, F), lambda c, k: (0, 0, 0)),  # partials (resident)
                pl.BlockSpec((E, 1), lambda c, k: (0, 0)),              # b1 (resident)
                pl.BlockSpec((E, O), lambda c, k: (0, 0)),              # W2 (resident)
                pl.BlockSpec((O, 1), lambda c, k: (0, 0)),              # b2 (resident)
                pl.BlockSpec((tile, O), node_map),                      # struct_embed tile
            ],
            out_specs=pl.BlockSpec((tile, F), node_map),
            scratch_shapes=[pltpu.VMEM((O, F), jnp.bfloat16)]),         # resident h2.T
        compiler_params=pltpu.CompilerParams(
            dimension_semantics=("parallel", "arbitrary"),
            vmem_limit_bytes=32 << 20),
        cost_estimate=dec_cost,
    )(partials, b1c, w2f, b2c, struct_embed)

    return x_hat


def _reference(x, struct_embed, w1, b1, w2, b2):
    h1 = jax.nn.relu(x.T @ w1 + b1)
    h2 = h1 @ w2 + b2
    return struct_embed @ h2.T


if __name__ == "__main__":
    # N nodes (= dense1 in_dim), F node features, E embed dim, O out dim.
    # N = 300 deliberately exercises the 2-core split + ragged last node tile.
    N, F, E, O = 300, 8, 32, 16
    key = jax.random.PRNGKey(0)
    keys = jax.random.split(key, 6)

    x = jax.random.normal(keys[0], (N, F), jnp.float32)
    struct_embed = jax.random.normal(keys[1], (N, O), jnp.float32)

    def uni(k, shape, fan_in):
        bound = 1.0 / (fan_in ** 0.5)
        return jax.random.uniform(k, shape, jnp.float32, -bound, bound)

    # Weights pre-transposed to [in, out] layout (== nn.Linear weight [out, in].T).
    w1 = uni(keys[2], (N, E), N)
    b1 = uni(keys[3], (E,), N)
    w2 = uni(keys[4], (E, O), E)
    b2 = uni(keys[5], (O,), E)

    ref = _reference(x, struct_embed, w1, b1, w2, b2)

    # Default large-tile path: tile = 256 -> 2 node tiles, 2-way split + mask.
    out_big = attribute_ae_forward(x, struct_embed, w1, b1, w2, b2)
    jax.block_until_ready(out_big)
    # Small-tile path: 3 node tiles of 128 -> also exercises the clamped
    # overhang tile on the second core.
    out_small = attribute_ae_forward(x, struct_embed, w1, b1, w2, b2,
                                     node_tile=128)
    jax.block_until_ready(out_small)

    for out in (out_big, out_small):
        assert out.shape == (N, F)
        assert bool(jnp.all(jnp.isfinite(out)))
        # Loose tolerance: x / W1 / struct_embed / h2 are streamed through the
        # MXU as bf16 (f32 accumulation).
        assert bool(jnp.allclose(out, ref, atol=1e-1, rtol=1e-1))
    print("KERNEL_OK")
</pallas_src>

<mosaic_0001>
module attributes {stable_mosaic.version = 11 : i64} {
  func.func @_encoder_kernel(%arg0: i32, %arg1: i32, %arg2: memref<256x8xf32, #tpu.memory_space<vmem>>, %arg3: memref<256x32xf32, #tpu.memory_space<vmem>>, %arg4: memref<1x32x8xf32, #tpu.memory_space<vmem>>) attributes {dimension_semantics = [#tpu.dimension_semantics<parallel>, #tpu.dimension_semantics<arbitrary>], iteration_bounds = array<i64: 2, 1>, scalar_prefetch = 0 : i64, scratch_operands = 0 : i64, tpu.core_type = #tpu.core_type<tc>, window_params = [{transform_indices = @transform_0, window_bounds = array<i64: 256, 8>}, {transform_indices = @transform_1, window_bounds = array<i64: 256, 32>}, {transform_indices = @transform_2, window_bounds = array<i64: 1, 32, 8>}]} {
    %c0_i32 = arith.constant 0 : i32
    %0 = arith.cmpi eq, %arg1, %c0_i32 : i32
    %1 = arith.extui %0 : i1 to i32
    %c0_i32_0 = arith.constant 0 : i32
    %2 = arith.cmpi ne, %1, %c0_i32_0 : i32
    scf.if %2 {
      %cst_12 = arith.constant 0.000000e+00 : f32
      %29 = vector.broadcast %cst_12 : f32 to vector<1x32x8xf32>
      %c0_13 = arith.constant 0 : index
      %c0_14 = arith.constant 0 : index
      %c0_15 = arith.constant 0 : index
      %30 = vector.load %arg4[%c0_13, %c0_14, %c0_15] : memref<1x32x8xf32, #tpu.memory_space<vmem>>, vector<1x32x8xf32>
      tpu.vector_store %arg4[%c0_13, %c0_14, %c0_15], %29 {strides = array<i32>} : memref<1x32x8xf32, #tpu.memory_space<vmem>>, vector<1x32x8xf32>,
    } else {
    }
    %c1_i32 = arith.constant 1 : i32
    %3 = arith.muli %arg0, %c1_i32 : i32
    %4 = arith.addi %3, %arg1 : i32
    %c256_i32 = arith.constant 256 : i32
    %5 = arith.muli %4, %c256_i32 : i32
    %c300_i32 = arith.constant 300 : i32
    %6 = arith.subi %c300_i32, %5 : i32
    %7 = tpu.iota {dimensions = array<i32: 0>} : vector<256x1xi32>
    %8 = vector.broadcast %6 : i32 to vector<256x1xi32>
    %9 = arith.cmpi slt, %7, %8 : vector<256x1xi32>
    %c0 = arith.constant 0 : index
    %c0_1 = arith.constant 0 : index
    %10 = vector.load %arg2[%c0, %c0_1] : memref<256x8xf32, #tpu.memory_space<vmem>>, vector<256x8xf32>
    %cst = arith.constant 0.000000e+00 : f32
    %11 = vector.shape_cast %9 : vector<256x1xi1> to vector<256x1xi1>
    %12 = vector.broadcast %11 : vector<256x1xi1> to vector<256x8xi1>
    %13 = vector.broadcast %cst : f32 to vector<256x8xf32>
    %14 = arith.select %12, %10, %13 : vector<256x8xi1>, vector<256x8xf32>
    %15 = arith.truncf %14 : vector<256x8xf32> to vector<256x8xbf16>
    %c0_2 = arith.constant 0 : index
    %c0_3 = arith.constant 0 : index
    %16 = vector.load %arg3[%c0_2, %c0_3] : memref<256x32xf32, #tpu.memory_space<vmem>>, vector<256x32xf32>
    %cst_4 = arith.constant 0.000000e+00 : f32
    %17 = vector.shape_cast %9 : vector<256x1xi1> to vector<256x1xi1>
    %18 = vector.broadcast %17 : vector<256x1xi1> to vector<256x32xi1>
    %19 = vector.broadcast %cst_4 : f32 to vector<256x32xf32>
    %20 = arith.select %18, %16, %19 : vector<256x32xi1>, vector<256x32xf32>
    %21 = arith.truncf %20 : vector<256x32xf32> to vector<256x32xbf16>
    %c0_5 = arith.constant 0 : index
    %c0_6 = arith.constant 0 : index
    %c0_7 = arith.constant 0 : index
    %22 = vector.load %arg4[%c0_5, %c0_6, %c0_7] : memref<1x32x8xf32, #tpu.memory_space<vmem>>, vector<1x32x8xf32>
    %23 = vector.shape_cast %22 : vector<1x32x8xf32> to vector<32x8xf32>
    %cst_8 = arith.constant dense<0.000000e+00> : vector<32x8xf32>
    %24 = tpu.matmul %21, %15, %cst_8 {dimension_numbers = #tpu.dot_dimension_numbers<[0], [0], [1], [1], [0, 1, 1, 1], [], []>} : vector<256x32xbf16>, vector<256x8xbf16>, vector<32x8xf32> -> vector<32x8xf32>
    %25 = arith.addf %23, %24 : vector<32x8xf32>
    %c0_9 = arith.constant 0 : index
    %c0_10 = arith.constant 0 : index
    %c0_11 = arith.constant 0 : index
    %26 = vector.load %arg4[%c0_9, %c0_10, %c0_11] : memref<1x32x8xf32, #tpu.memory_space<vmem>>, vector<1x32x8xf32>
    %27 = vector.shape_cast %26 : vector<1x32x8xf32> to vector<32x8xf32>
    %28 = vector.shape_cast %25 : vector<32x8xf32> to vector<1x32x8xf32>
    tpu.vector_store %arg4[%c0_9, %c0_10, %c0_11], %28 {strides = array<i32>} : memref<1x32x8xf32, #tpu.memory_space<vmem>>, vector<1x32x8xf32>,
    return
  }
  func.func @transform_0(%arg0: i32, %arg1: i32) -> (i32, i32) {
    %c1_i32 = arith.constant 1 : i32
    %0 = arith.muli %arg0, %c1_i32 : i32
    %1 = arith.addi %0, %arg1 : i32
    %c1_i32_0 = arith.constant 1 : i32
    %2 = arith.minsi %1, %c1_i32_0 : i32
    %c0_i32 = arith.constant 0 : i32
    %c0_i32_1 = arith.constant 0 : i32
    return %2, %c0_i32 : i32, i32
  }
  func.func @transform_1(%arg0: i32, %arg1: i32) -> (i32, i32) {
    %c1_i32 = arith.constant 1 : i32
    %0 = arith.muli %arg0, %c1_i32 : i32
    %1 = arith.addi %0, %arg1 : i32
    %c1_i32_0 = arith.constant 1 : i32
    %2 = arith.minsi %1, %c1_i32_0 : i32
    %c0_i32 = arith.constant 0 : i32
    %c0_i32_1 = arith.constant 0 : i32
    return %2, %c0_i32 : i32, i32
  }
  func.func @transform_2(%arg0: i32, %arg1: i32) -> (i32, i32, i32) {
    %c0_i32 = arith.constant 0 : i32
    %c0_i32_0 = arith.constant 0 : i32
    %c0_i32_1 = arith.constant 0 : i32
    return %arg0, %c0_i32, %c0_i32_0 : i32, i32, i32
  }
}

</mosaic_0001>

<bundles_post_ra>
// kernel: tpu_custom_call.1
= control target key start
LH: loop header
LB: loop body
LE: loop exit
PB: predicated region body
PF: predicated region fallthrough
CT: control target
= control target key end

     0   :  { %s906_s9 = smov 0   ;;  %s908_s10 = smov 0   ;;  %s1423_s0 = inlined_call_operand.vmem [shape: f32[300,8], index: 0, kind: input, shape index: {}]   ;;  %s1424_s1 = inlined_call_operand.vmem [shape: f32[300,32], index: 1, kind: input, shape index: {}]   ;;  %s1425_s2 = inlined_call_operand.vmem [shape: f32[2,32,8], index: 2, kind: output, shape index: {}]  }
   0x1   :  { %s910_s11 = smov 0  }
   0x2 LB: > { %s24_s12 = sadd.s32 1, %s884_s10  ;;  %p738_p0 = scmp.ge.s32.totalorder %s888_s11, 1  ;;  %s888_s11 = sphi %s910_s11, %s12_s11   ;;  %s884_s10 = sphi %s908_s10, %s1463_s10   ;;  %s880_s9 = sphi %s906_s9, %s1462_s9  }
   0x3   : > { %p26_p1 = scmp.ge.s32.totalorder %s24_s12, 2  ;;  %p176_p2 = scmp.lt.s32.totalorder %s888_s11, 3 }
   0x5   : > { %s1465_s12 = smov (%p26_p1, %s24_s12), 0  ;;  %p177_p3 = pnand %p738_p0, %p176_p2 }
   0x6   : > { %p218_p4 = scmp.lt.s32.totalorder (!%p177_p3), %s880_s9, 1  ;;  %s745_s13 = sshll.u32 (!%p177_p3), %s880_s9, 8  ;;  %v275_v0 = vlaneseq (!%p177_p3) }
   0x7   : > { %180 = sbr.rel (%p177_p3) target bundleno = 354 (0x162), region = 28  ;;  %s274_s14 = ssub.s32 (!%p177_p3), 300, %s745_s13 }
   0x8   : > { %v924_v1 = vshrl.u32 (!%p177_p3), %v275_v0, 7  ;;  %v934_v4 = vstv (!%p177_p3), %s274_s14 }
   0xa   : > { %v929_v2 = vadd.s32 (!%p177_p3), 128, %v924_v1  ;;  %v932_v3 = vadd.s32 (!%p177_p3), 136, %v924_v1  ;;  %v937_v5 = vadd.s32 (!%p177_p3), 8, %v924_v1  ;;  %v941_v6 = vadd.s32 (!%p177_p3), 144, %v924_v1 }
   0xb   : > { %v944_v7 = vadd.s32 (!%p177_p3), 152, %v924_v1  ;;  %v947_v8 = vadd.s32 (!%p177_p3), 16, %v924_v1  ;;  %v950_v9 = vadd.s32 (!%p177_p3), 24, %v924_v1  ;;  %v953_v10 = vadd.s32 (!%p177_p3), 160, %v924_v1 }
   0xc   : > { %vm325_vm0 = vcmp.lt.s32.totalorder (!%p177_p3), %v929_v2, %v934_v4  ;;  %vm326_vm1 = vcmp.lt.s32.totalorder (!%p177_p3), %v932_v3, %v934_v4  ;;  %vm309_vm2 = vcmp.lt.s32.totalorder (!%p177_p3), %v924_v1, %v934_v4  ;;  %vm310_vm3 = vcmp.lt.s32.totalorder (!%p177_p3), %v937_v5, %v934_v4 }
   0xd   : > { %vm327_vm4 = vcmp.lt.s32.totalorder (!%p177_p3), %v941_v6, %v934_v4  ;;  %v969_v11 = vadd.s32 (!%p177_p3), 168, %v924_v1  ;;  %v972_v12 = vadd.s32 (!%p177_p3), 32, %v924_v1  ;;  %v975_v13 = vadd.s32 (!%p177_p3), 40, %v924_v1 }
   0xe   : > { %s1467_s9 = smov (!%p218_p4, %s880_s9), 1  ;;  %vm328_vm5 = vcmp.lt.s32.totalorder %v944_v7, %v934_v4  ;;  %vm311_vm6 = vcmp.lt.s32.totalorder %v947_v8, %v934_v4  ;;  %vm312_vm7 = vcmp.lt.s32.totalorder %v950_v9, %v934_v4  ;;  %v985_v14 = vadd.s32 176, %v924_v1 }
   0xf   : > { %s926_s15 = sshll.u32 %s1467_s9, 5  ;;  %vm329_vm8 = vcmp.lt.s32.totalorder %v953_v10, %v934_v4  ;;  %v997_v15 = vadd.s32 184, %v924_v1  ;;  %v1000_v16 = vadd.s32 48, %v924_v1  ;;  %v1003_v17 = vadd.s32 56, %v924_v1 }
  0x10   : > { %p225_p5 = scmp.lt.s32.totalorder %s926_s15, 37  ;;  %vm1426_vm9 = vcmp.lt.s32.totalorder %v969_v11, %v934_v4  ;;  %vm313_vm10 = vcmp.lt.s32.totalorder %v972_v12, %v934_v4  ;;  %vm314_vm11 = vcmp.lt.s32.totalorder %v975_v13, %v934_v4  ;;  %v1015_v21 = vadd.s32 192, %v924_v1  ;;  %s261_s26 = scalar_lea.vmem %s1425_s2, %s926_s15 }
  0x11   : > { %vm1428_vm12 = vcmp.lt.s32.totalorder %v985_v14, %v934_v4  ;;  %vm1427_vm13 = vcmp.lt.s32.totalorder %v997_v15, %v934_v4  ;;  %vm1434_vm14 = vcmp.lt.s32.totalorder %v1000_v16, %v934_v4  ;;  %vm1429_vm15 = vcmp.lt.s32.totalorder %v1003_v17, %v934_v4 }
  0x12   : > { %s956_s16 = scalar_select %p225_p5, %s926_s15, 37  ;;  %v1083_v54 = vadd.s32 200, %v924_v1  ;;  %v1086_v55 = vadd.s32 64, %v924_v1  ;;  %v1095_v59 = vadd.s32 72, %v924_v1  ;;  %v1105_v63 = vadd.s32 208, %v924_v1 }
  0x13   : > { %v1108_v0 = vadd.s32 216, %v924_v1  ;;  %v1212_v5 = vadd.s32 240, %v924_v1 }
  0x14   : > { %s740_s17 = sshll.u32 %s956_s16, 3 }
  0x15   : > { %s992_s20 = scalar_lea.vmem %s1424_s1, %s740_s17  ;;  %s1136_s23 = scalar_lea.vmem %s1423_s0, %s740_s17 }
  0x16   : > { %v501_v18 = vld [vmem:[%s992_s20 + $0x80] sm:$0xff]  ;;  %v502_v19 = vld [vmem:[%s992_s20 + $0x88] sm:$0xff]  ;;  %v503_v26 = vld [vmem:[%s992_s20 + $0x90] sm:$0xff] }
  0x17   : > { %v485_v20 = vld [vmem:[%s992_s20] sm:$0xff]  ;;  %v533_v22 = vsel %vm325_vm0, %v501_v18, 0.0  ;;  %v534_v23 = vsel %vm326_vm1, %v502_v19, 0.0  ;;  %v486_v24 = vld [vmem:[%s992_s20 + $0x8] sm:$0xff]  ;;  %v504_v27 = vld [vmem:[%s992_s20 + $0x98] sm:$0xff]  ;;  %v535_v30 = vsel %vm327_vm4, %v503_v26, 0.0 }
  0x18   : > { %v517_v25 = vsel %vm309_vm2, %v485_v20, 0.0  ;;  %v557_v28 = vpack.c.bf16 %v534_v23, %v533_v22  ;;  %v518_v29 = vsel %vm310_vm3, %v486_v24, 0.0  ;;  %v536_v31 = vsel %vm328_vm5, %v504_v27, 0.0  ;;  %v487_v32 = vld [vmem:[%s992_s20 + $0x10] sm:$0xff]  ;;  %v488_v33 = vld [vmem:[%s992_s20 + $0x18] sm:$0xff]  ;;  %v505_v34 = vld [vmem:[%s992_s20 + $0xa0] sm:$0xff] }
  0x19   : > { %v549_v35 = vpack.c.bf16 %v518_v29, %v517_v25  ;;  %v519_v36 = vsel %vm311_vm6, %v487_v32, 0.0  ;;  %v520_v37 = vsel %vm312_vm7, %v488_v33, 0.0  ;;  %v506_v38 = vld [vmem:[%s992_s20 + $0xa8] sm:$0xff]  ;;  %v489_v39 = vld [vmem:[%s992_s20 + $0x20] sm:$0xff]  ;;  %v558_v41 = vpack.c.bf16 %v536_v31, %v535_v30  ;;  %v507_v44 = vld [vmem:[%s992_s20 + $0xb0] sm:$0xff] }
  0x1a   : > { %v490_v40 = vld [vmem:[%s992_s20 + $0x28] sm:$0xff]  ;;  %585 = vxpose.xlu0.c.b16.start [1/8] (narrow) %v557_v28, 32  ;;  %v537_v42 = vsel %vm329_vm8, %v505_v34, 0.0  ;;  %v538_v43 = vsel %vm1426_vm9, %v506_v38, 0.0  ;;  %v508_v45 = vld [vmem:[%s992_s20 + $0xb8] sm:$0xff]  ;;  %v550_v46 = vpack.c.bf16 %v520_v37, %v519_v36  ;;  %v521_v47 = vsel %vm313_vm10, %v489_v39, 0.0 }
  0x1b   : > { %569 = vxpose.xlu1.c.b16.start [1/8] (narrow) %v549_v35, 32  ;;  %v522_v48 = vsel %vm314_vm11, %v490_v40, 0.0  ;;  %v491_v49 = vld [vmem:[%s992_s20 + $0x30] sm:$0xff]  ;;  %v492_v50 = vld [vmem:[%s992_s20 + $0x38] sm:$0xff]  ;;  %v559_v51 = vpack.c.bf16 %v538_v43, %v537_v42  ;;  %vm1432_vm9 = vcmp.lt.s32.totalorder %v1015_v21, %v934_v4  ;;  %v539_v52 = vsel %vm1428_vm12, %v507_v44, 0.0  ;;  %v509_v60 = vld [vmem:[%s992_s20 + $0xc0] sm:$0xff] }
  0x1c   : > { %v540_v53 = vsel %vm1427_vm13, %v508_v45, 0.0  ;;  %v551_v56 = vpack.c.bf16 %v522_v48, %v521_v47  ;;  %v523_v57 = vsel %vm1434_vm14, %v491_v49, 0.0  ;;  %v524_v58 = vsel %vm1429_vm15, %v492_v50, 0.0  ;;  %v510_v61 = vld [vmem:[%s992_s20 + $0xc8] sm:$0xff]  ;;  %v493_v62 = vld [vmem:[%s992_s20 + $0x40] sm:$0xff]  ;;  %v511_v29 = vld [vmem:[%s992_s20 + $0xd0] sm:$0xff] }
  0x1d   : > { %vm1430_vm13 = vcmp.lt.s32.totalorder %v1083_v54, %v934_v4  ;;  %vm1431_vm12 = vcmp.lt.s32.totalorder %v1086_v55, %v934_v4  ;;  %vm1433_vm15 = vcmp.lt.s32.totalorder %v1095_v59, %v934_v4  ;;  %v494_v18 = vld [vmem:[%s992_s20 + $0x48] sm:$0xff]  ;;  %v1114_v19 = vadd.s32 80, %v924_v1  ;;  %v512_v30 = vld [vmem:[%s992_s20 + $0xd8] sm:$0xff]  ;;  %v495_v32 = vld [vmem:[%s992_s20 + $0x50] sm:$0xff] }
  0x1e   : > { %586 = vxpose.xlu0.c.b16.cont [2/8] (narrow) %v558_v41, 32  ;;  %v1117_v20 = vadd.s32 88, %v924_v1  ;;  %v560_v22 = vpack.c.bf16 %v540_v53, %v539_v52  ;;  %v552_v23 = vpack.c.bf16 %v524_v58, %v523_v57  ;;  %v541_v24 = vsel %vm1432_vm9, %v509_v60, 0.0  ;;  %v496_v33 = vld [vmem:[%s992_s20 + $0x58] sm:$0xff]  ;;  %v357_v36 = vld [vmem:[%s1136_s23 + $0x80] sm:$0xff]  ;;  %vm1169_vm14 = vmpackc.low %vm326_vm1, %vm325_vm0 }
  0x1f   : > { %570 = vxpose.xlu1.c.b16.cont [2/8] (narrow) %v550_v46, 32  ;;  %v542_v25 = vsel %vm1430_vm13, %v510_v61, 0.0  ;;  %v525_v26 = vsel %vm1431_vm12, %v493_v62, 0.0  ;;  %v1129_v27 = vadd.s32 224, %v924_v1  ;;  %v526_v28 = vsel %vm1433_vm15, %v494_v18, 0.0  ;;  %v358_v3 = vld [vmem:[%s1136_s23 + $0x88] sm:$0xff] }
  0x20   : > { %vm335_vm13 = vcmp.lt.s32.totalorder %v1105_v63, %v934_v4  ;;  %vm1435_vm12 = vcmp.lt.s32.totalorder %v1108_v0, %v934_v4  ;;  %v1148_v31 = vadd.s32 232, %v924_v1  ;;  %vm1437_vm9 = vcmp.lt.s32.totalorder %v1114_v19, %v934_v4  ;;  %v341_v41 = vld [vmem:[%s1136_s23] sm:$0xff]  ;;  %v342_v42 = vld [vmem:[%s1136_s23 + $0x8] sm:$0xff]  ;;  %v359_v46 = vld [vmem:[%s1136_s23 + $0x90] sm:$0xff] }
  0x21   : > { %vm1436_vm15 = vcmp.lt.s32.totalorder %v1117_v20, %v934_v4  ;;  %v1157_v34 = vadd.s32 96, %v924_v1  ;;  %v1160_v35 = vadd.s32 104, %v924_v1  ;;  %v561_v38 = vpack.c.bf16 %v542_v25, %v541_v24  ;;  %v360_v47 = vld [vmem:[%s1136_s23 + $0x98] sm:$0xff]  ;;  %v513_v48 = vld [vmem:[%s992_s20 + $0xe0] sm:$0xff]  ;;  %v514_v49 = vld [vmem:[%s992_s20 + $0xe8] sm:$0xff] }
  0x22   : > { %587 = vxpose.xlu0.c.b16.cont [3/8] (narrow) %v559_v51, 32  ;;  %v553_v39 = vpack.c.bf16 %v526_v28, %v525_v26  ;;  %v543_v40 = vsel %vm335_vm13, %v511_v29, 0.0  ;;  %v544_v2 = vsel %vm1435_vm12, %v512_v30, 0.0  ;;  %v527_v43 = vsel %vm1437_vm9, %v495_v32, 0.0  ;;  %vm1198_vm12 = vmpackc.low %vm310_vm3, %vm309_vm2  ;;  %v497_v50 = vld [vmem:[%s992_s20 + $0x60] sm:$0xff]  ;;  %v498_v52 = vld [vmem:[%s992_s20 + $0x68] sm:$0xff] }
  0x23   : > { %571 = vxpose.xlu1.c.b16.cont [3/8] (narrow) %v551_v56, 32  ;;  %v528_v44 = vsel %vm1436_vm15, %v496_v33, 0.0  ;;  %vm337_vm0 = vcmp.lt.s32.totalorder %v1129_v27, %v934_v4  ;;  %vm338_vm1 = vcmp.lt.s32.totalorder %v1148_v31, %v934_v4  ;;  %vm321_vm15 = vcmp.lt.s32.totalorder %v1157_v34, %v934_v4  ;;  %v343_v60 = vld [vmem:[%s1136_s23 + $0x10] sm:$0xff]  ;;  %v344_v61 = vld [vmem:[%s1136_s23 + $0x18] sm:$0xff]  ;;  %vm1232_vm2 = vmpackc.low %vm328_vm5, %vm327_vm4 }
  0x24   : > { %vm1438_vm9 = vcmp.lt.s32.totalorder %v1160_v35, %v934_v4  ;;  %v1215_v51 = vadd.s32 248, %v924_v1  ;;  %v1219_v53 = vadd.s32 112, %v924_v1  ;;  %v1222_v56 = vadd.s32 120, %v924_v1  ;;  %vm1255_vm3 = vmpackc.low %vm312_vm7, %vm311_vm6  ;;  %v515_v8 = vld [vmem:[%s992_s20 + $0xf0] sm:$0xff]  ;;  %v516_v29 = vld [vmem:[%s992_s20 + $0xf8] sm:$0xff] }
  0x25   : > { %v771_v57 = vpack.c.bf16 %v358_v3, %v357_v36  ;;  %v747_v58 = vpack.c.bf16 %v342_v42, %v341_v41  ;;  %v562_v62 = vpack.c.bf16 %v544_v2, %v543_v40  ;;  %v774_v1 = vpack.c.bf16 %v360_v47, %v359_v46  ;;  %v499_v30 = vld [vmem:[%s992_s20 + $0x70] sm:$0xff]  ;;  %v500_v32 = vld [vmem:[%s992_s20 + $0x78] sm:$0xff]  ;;  %v345_v36 = vld [vmem:[%s1136_s23 + $0x20] sm:$0xff] }
  0x26   : > { %588 = vxpose.xlu0.c.b16.cont [4/8] (narrow) %v560_v22, 32  ;;  %v361_v22 = vld [vmem:[%s1136_s23 + $0xa0] sm:$0xff]  ;;  %v554_v24 = vpack.c.bf16 %v528_v44, %v527_v43  ;;  %v545_v25 = vsel %vm337_vm0, %v513_v48, 0.0  ;;  %v546_v6 = vsel %vm338_vm1, %v514_v49, 0.0  ;;  %v529_v7 = vsel %vm321_vm15, %v497_v50, 0.0  ;;  %v363_v40 = vld [vmem:[%s1136_s23 + $0xb0] sm:$0xff] }
  0x27   : > { %572 = vxpose.xlu1.c.b16.cont [4/8] (narrow) %v552_v23, 32  ;;  %v362_v23 = vld [vmem:[%s1136_s23 + $0xa8] sm:$0xff]  ;;  %797 = vmatprep.subr.msk.bf16.mxu0 %vm1169_vm14, %v771_v57  ;;  %v530_v28 = vsel %vm1438_vm9, %v498_v52, 0.0  ;;  %vm339_vm4 = vcmp.lt.s32.totalorder %v1212_v5, %v934_v4  ;;  %vm340_vm5 = vcmp.lt.s32.totalorder %v1215_v51, %v934_v4  ;;  %v750_v9 = vpack.c.bf16 %v344_v61, %v343_v60  ;;  %v364_v2 = vld [vmem:[%s1136_s23 + $0xb8] sm:$0xff]  ;;  %v347_v45 = vld [vmem:[%s1136_s23 + $0x30] sm:$0xff] }
  0x28   : > { %798 = vmatpush3.bf16.msk.msra.mxu0 %vm1198_vm12, %v747_v58  ;;  %825 = vmatprep.subr.msk.bf16.mxu1 %vm1169_vm14, %v771_v57  ;;  %vm323_vm6 = vcmp.lt.s32.totalorder %v1219_v53, %v934_v4  ;;  %vm324_vm7 = vcmp.lt.s32.totalorder %v1222_v56, %v934_v4  ;;  %v777_v33 = vpack.c.bf16 %v362_v23, %v361_v22  ;;  %v547_v41 = vsel %vm339_vm4, %v515_v8, 0.0  ;;  %v348_v46 = vld [vmem:[%s1136_s23 + $0x38] sm:$0xff]  ;;  %v365_v12 = vld [vmem:[%s1136_s23 + $0xc0] sm:$0xff]  ;;  %v366_v13 = vld [vmem:[%s1136_s23 + $0xc8] sm:$0xff] }
  0x29   : > { %799 = vmatprep.subr.msk.bf16.mxu0 %vm1232_vm2, %v774_v1  ;;  %833 = vmatpush3.bf16.msk.msra.mxu1 %vm1198_vm12, %v747_v58  ;;  %v563_v37 = vpack.c.bf16 %v546_v6, %v545_v25  ;;  %vm1447_vm14 = vcmp.lt.s32.totalorder %v969_v11, %v934_v4  ;;  %v555_v3 = vpack.c.bf16 %v530_v28, %v529_v7  ;;  %v548_v10 = vsel %vm340_vm5, %v516_v29, 0.0  ;;  %v350_v50 = vld [vmem:[%s1136_s23 + $0x48] sm:$0xff]  ;;  %v368_v52 = vld [vmem:[%s1136_s23 + $0xd8] sm:$0xff]  ;;  %v369_v58 = vld [vmem:[%s1136_s23 + $0xe0] sm:$0xff] }
  0x2a   : > { %589 = vxpose.xlu0.c.b16.cont [5/8] (narrow) %v561_v38, 32  ;;  %v346_v38 = vld [vmem:[%s1136_s23 + $0x28] sm:$0xff]  ;;  %826 = vmatprep.subr.msk.bf16.mxu1 %vm1232_vm2, %v774_v1  ;;  %vm1292_vm9 = vmpackc.low %vm1447_vm14, %vm329_vm8  ;;  %v531_v11 = vsel %vm323_vm6, %v499_v30, 0.0  ;;  %v532_v42 = vsel %vm324_vm7, %v500_v32, 0.0  ;;  %v780_v44 = vpack.c.bf16 %v364_v2, %v363_v40  ;;  %v564_v47 = vpack.c.bf16 %v548_v10, %v547_v41  ;;  %v352_v57 = vld [vmem:[%s1136_s23 + $0x58] sm:$0xff] }
  0x2b   : > { %573 = vxpose.xlu1.c.b16.cont [5/8] (narrow) %v553_v39, 32  ;;  %v753_v43 = vpack.c.bf16 %v346_v38, %v345_v36  ;;  %vm752_vm8 = vmpackc.low %vm314_vm11, %vm313_vm10  ;;  %vm1450_vm12 = vcmp.lt.s32.totalorder %v985_v14, %v934_v4  ;;  %vm1451_vm2 = vcmp.lt.s32.totalorder %v997_v15, %v934_v4  ;;  %v556_v48 = vpack.c.bf16 %v532_v42, %v531_v11  ;;  %v349_v15 = vld [vmem:[%s1136_s23 + $0x40] sm:$0xff]  ;;  %v354_v61 = vld [vmem:[%s1136_s23 + $0x68] sm:$0xff] }
  0x2c   : > { %800 = vmatpush3.bf16.msk.msra.mxu0 %vm1255_vm3, %v750_v9  ;;  %v756_v49 = vpack.c.bf16 %v348_v46, %v347_v45  ;;  %vm1453_vm10 = vcmp.lt.s32.totalorder %v1003_v17, %v934_v4  ;;  %v783_v14 = vpack.c.bf16 %v366_v13, %v365_v12  ;;  %vm1454_vm14 = vcmp.lt.s32.totalorder %v1015_v21, %v934_v4  ;;  %v353_v63 = vld [vmem:[%s1136_s23 + $0x60] sm:$0xff]  ;;  %v355_v18 = vld [vmem:[%s1136_s23 + $0x70] sm:$0xff]  ;;  %v356_v27 = vld [vmem:[%s1136_s23 + $0x78] sm:$0xff] }
  0x2d   : > { %801 = vmatprep.subr.msk.bf16.mxu0 %vm1292_vm9, %v777_v33  ;;  %834 = vmatpush3.bf16.msk.msra.mxu1 %vm1255_vm3, %v750_v9  ;;  %vm779_vm3 = vmpackc.low %vm1451_vm2, %vm1450_vm12  ;;  %v759_v17 = vpack.c.bf16 %v350_v50, %v349_v15  ;;  %vm1456_vm2 = vcmp.lt.s32.totalorder %v1086_v55, %v934_v4  ;;  %v370_v55 = vld [vmem:[%s1136_s23 + $0xe8] sm:$0xff]  ;;  %v768_v31 = vpack.c.bf16 %v356_v27, %v355_v18  ;;  %v890_v53 = vmov 0.0  }
  0x2e   : > { %590 = vxpose.xlu0.c.b16.cont [6/8] (narrow) %v562_v62, 32  ;;  %827 = vmatprep.subr.msk.bf16.mxu1 %vm1292_vm9, %v777_v33  ;;  %vm1452_vm9 = vcmp.lt.s32.totalorder %v1000_v16, %v934_v4  ;;  %v367_v16 = vld [vmem:[%s1136_s23 + $0xd0] sm:$0xff]  ;;  %v372_v62 = vld [vmem:[%s1136_s23 + $0xf8] sm:$0xff] }
  0x2f   : > { %574 = vxpose.xlu1.c.b16.cont [6/8] (narrow) %v554_v24, 32  ;;  %vm755_vm11 = vmpackc.low %vm1453_vm10, %vm1452_vm9  ;;  %v786_v21 = vpack.c.bf16 %v368_v52, %v367_v16  ;;  %vm1458_vm10 = vcmp.lt.s32.totalorder %v1108_v0, %v934_v4  ;;  %v371_v0 = vld [vmem:[%s1136_s23 + $0xf0] sm:$0xff] }
  0x30   : > { %802 = vmatpush3.bf16.msk.msra.mxu0 %vm752_vm8, %v753_v43 }
  0x31   : > { %803 = vmatprep.subr.msk.bf16.mxu0 %vm779_vm3, %v780_v44  ;;  %835 = vmatpush3.bf16.msk.msra.mxu1 %vm752_vm8, %v753_v43  ;;  %vm1455_vm8 = vcmp.lt.s32.totalorder %v1083_v54, %v934_v4  ;;  %v351_v54 = vld [vmem:[%s1136_s23 + $0x50] sm:$0xff] }
  0x32   : > { %591 = vxpose.xlu0.c.b16.cont [7/8] (narrow) %v563_v37, 32  ;;  %828 = vmatprep.subr.msk.bf16.mxu1 %vm779_vm3, %v780_v44  ;;  %vm782_vm12 = vmpackc.low %vm1455_vm8, %vm1454_vm14  ;;  %vm1457_vm3 = vcmp.lt.s32.totalorder %v1095_v59, %v934_v4  ;;  %v762_v60 = vpack.c.bf16 %v352_v57, %v351_v54  ;;  %vm1459_vm14 = vcmp.lt.s32.totalorder %v1114_v19, %v934_v4 }
  0x33   : > { %575 = vxpose.xlu1.c.b16.cont [7/8] (narrow) %v555_v3, 32  ;;  %vm758_vm9 = vmpackc.low %vm1457_vm3, %vm1456_vm2  ;;  %vm1460_vm8 = vcmp.lt.s32.totalorder %v1117_v20, %v934_v4  ;;  %v789_v59 = vpack.c.bf16 %v370_v55, %v369_v58  ;;  %v765_v19 = vpack.c.bf16 %v354_v61, %v353_v63  ;;  %vm1461_vm2 = vcmp.lt.s32.totalorder %v1160_v35, %v934_v4 }
  0x34   : > { %804 = vmatpush3.bf16.msk.msra.mxu0 %vm755_vm11, %v756_v49  ;;  %vm764_vm3 = vmpackc.low %vm1461_vm2, %vm321_vm15  ;;  %v792_v20 = vpack.c.bf16 %v372_v62, %v371_v0 }
  0x35   : > { %805 = vmatprep.subr.msk.bf16.mxu0 %vm782_vm12, %v783_v14  ;;  %836 = vmatpush3.bf16.msk.msra.mxu1 %vm755_vm11, %v756_v49  ;;  %vm785_vm11 = vmpackc.low %vm1458_vm10, %vm335_vm13 }
  0x36   : > { %592 = vxpose.xlu0.c.b16.end [8/8] (narrow) %v564_v47, 32  ;;  %829 = vmatprep.subr.msk.bf16.mxu1 %vm782_vm12, %v783_v14  ;;  %vm761_vm12 = vmpackc.low %vm1460_vm8, %vm1459_vm14 }
  0x37   : > { %576 = vxpose.xlu1.c.b16.end [8/8] (narrow) %v556_v48, 32  ;;  %vm788_vm13 = vmpackc.low %vm338_vm1, %vm337_vm0  ;;  %vm267_vm1 = vcmask 64512  }
  0x38   : > { %806 = vmatpush3.bf16.msk.msra.mxu0 %vm758_vm9, %v759_v17  ;;  %vm791_vm0 = vmpackc.low %vm340_vm5, %vm339_vm4  ;;  %268 = vst.msk [vmem:[%s261_s26] sm:$0xff] %vm267_vm1, %v890_v53 }
  0x39   : > { %807 = vmatprep.subr.msk.bf16.mxu0 %vm785_vm11, %v786_v21  ;;  %837 = vmatpush3.bf16.msk.msra.mxu1 %vm758_vm9, %v759_v17  ;;  %vm767_vm15 = vmpackc.low %vm324_vm7, %vm323_vm6  ;;  %269 = vst.msk [vmem:[%s261_s26 + $0x8] sm:$0xff] %vm267_vm1, %v890_v53 }
  0x3a   : > { %830 = vmatprep.subr.msk.bf16.mxu1 %vm785_vm11, %v786_v21  ;;  %270 = vst.msk [vmem:[%s261_s26 + $0x10] sm:$0xff] %vm267_vm1, %v890_v53  ;;  %271 = vst.msk [vmem:[%s261_s26 + $0x18] sm:$0xff] %vm267_vm1, %v890_v53 }
  0x3c   : > { %808 = vmatpush3.bf16.msk.msra.mxu0 %vm761_vm12, %v762_v60 }
  0x3d   : > { %809 = vmatprep.subr.msk.bf16.mxu0 %vm788_vm13, %v789_v59  ;;  %838 = vmatpush3.bf16.msk.msra.mxu1 %vm761_vm12, %v762_v60 }
  0x3e   : > { %831 = vmatprep.subr.msk.bf16.mxu1 %vm788_vm13, %v789_v59 }
  0x3f   : > { %v565_v56 = vld [vmem:[%s261_s26] sm:$0xff] }
  0x40   : > { %810 = vmatpush3.bf16.msk.msra.mxu0 %vm764_vm3, %v765_v19  ;;  %v566_v24 = vld [vmem:[%s261_s26 + $0x8] sm:$0xff] }
  0x41   : > { %811 = vmatprep.subr.msk.bf16.mxu0 %vm791_vm0, %v792_v20  ;;  %839 = vmatpush3.bf16.msk.msra.mxu1 %vm764_vm3, %v765_v19  ;;  %v567_v28 = vld [vmem:[%s261_s26 + $0x10] sm:$0xff]  ;;  %v568_v32 = vld [vmem:[%s261_s26 + $0x18] sm:$0xff] }
  0x42   : > { %832 = vmatprep.subr.msk.bf16.mxu1 %vm791_vm0, %v792_v20 }
  0x44   : > { %812 = vmatpush3.bf16.msk.msra.mxu0 %vm767_vm15, %v768_v31 }
  0x45   : > { %840 = vmatpush3.bf16.msk.msra.mxu1 %vm767_vm15, %v768_v31 }
  0x80   : > { %v593_v34 = vpop.trf.xlu0 }
  0x81   : > { %633 = vmatprep.mubr.bf16.mxu0 %v593_v34  ;;  %v577_v35 = vpop.trf.xlu1 }
  0x82   : > { %634 = vmatmul.mubr.bf16.vlgmr.msra.gmra.mrb[0].mxu0 %v577_v35 }
  0x84   : > { %v594_v5 = vpop.trf.xlu0 }
  0x85   : > { %641 = vmatprep.mubr.bf16.mxu1 %v594_v5  ;;  %v578_v51 = vpop.trf.xlu1 }
  0x86   : > { %642 = vmatmul.mubr.bf16.vlgmr.msra.gmra.mrb[0].mxu1 %v578_v51 }
 0x155   : > { %v813_v4 = vpop.f32.mrb[0].mxu0 }
 0x156   : > { %v814_v1 = vpop.f32.mrb[1].mxu0 }
 0x157   : > { %v815_v22 = vadd.f32 %v814_v1, %v813_v4  ;;  %v816_v23 = vpop.f32.mrb[2].mxu0 }
 0x158   : > { %v817_v25 = vpop.f32.mrb[3].mxu0 }
 0x159   : > { %v650_v6 = vadd.f32 %v815_v22, %v565_v56  ;;  %v818_v7 = vadd.f32 %v817_v25, %v816_v23  ;;  %v819_v26 = vpop.f32.mrb[0].mxu1 }
 0x15a   : > { %v820_v8 = vpop.f32.mrb[1].mxu1 }
 0x15b   : > { %655 = vst.msk [vmem:[%s261_s26] sm:$0xff] %vm267_vm1, %v650_v6  ;;  %v651_v29 = vadd.f32 %v818_v7, %v566_v24  ;;  %v821_v30 = vadd.f32 %v820_v8, %v819_v26  ;;  %v822_v9 = vpop.f32.mrb[2].mxu1 }
 0x15c   : > { %v823_v33 = vpop.f32.mrb[3].mxu1 }
 0x15d   : > { %656 = vst.msk [vmem:[%s261_s26 + $0x8] sm:$0xff] %vm267_vm1, %v651_v29  ;;  %v652_v36 = vadd.f32 %v821_v30, %v567_v28  ;;  %v824_v38 = vadd.f32 %v823_v33, %v822_v9 }
 0x15f   : > { %657 = vst.msk [vmem:[%s261_s26 + $0x10] sm:$0xff] %vm267_vm1, %v652_v36  ;;  %v653_v37 = vadd.f32 %v824_v38, %v568_v32 }
 0x161   : > { %658 = vst.msk [vmem:[%s261_s26 + $0x18] sm:$0xff] %vm267_vm1, %v653_v37 }
 0x162 PF: > { %s12_s11 = sadd.s32 1, %s888_s11   ;;  %s1462_s9 = smov %s884_s10 }
 0x163   : > { %p9_p6 = scmp.ge.s32.totalorder %s12_s11, 4   ;;  %s1463_s10 = smov %s1465_s12 }
 0x165   :  { %11 = sbr.rel (!%p9_p6) target bundleno = 2 (0x2), region = 65 }

</bundles_post_ra>
